<compile_context>
chip_gen: v7x
topology: tpu7x:2x2x1
jax: 0.10.0
libtpu: 0.0.40
codegen_flags: <defaults>
</compile_context>

<pallas_src>
import jax
import jax.numpy as jnp
from jax.experimental import pallas as pl
from jax.experimental.pallas import tpu as pltpu


def three_stream_kernel(
    xall_ref,            # (B*(T+2), Fi) bf16: rows = [image(B) | frames b-major (B*T) | audio zero-padded (B)]
    w1_ref, b1_ref,      # (Fi, 3H) bf16, (1, 3H) f32 : [w1s | wf | wa1(pad K)]
    w2_ref, b2_ref,      # (3H, c) bf16, (3, c) f32   : [w2s; w2t; wa2], [b2s; b2t; ba2]
    wg_ref, bg_ref,      # (3, 3c) f32, (3, 1) f32    : MoE gate
    we_ref, be_ref,      # (c, c) bf16, (1, c) f32    : shared expert FC
    out_ref,             # (B, c) f32
):
    f32 = jnp.float32
    bf16 = jnp.bfloat16
    B, c = out_ref.shape
    H3 = w1_ref.shape[1]
    Hh = H3 // 3
    R = xall_ref.shape[0]
    T = R // B - 2

    # ---- fused first layer: image L1 + per-frame shared FC + audio L1 --------
    # One MXU dot instead of three serialized small dots.
    h_all = jnp.dot(xall_ref[...], w1_ref[...], preferred_element_type=f32)
    h_all = jnp.maximum(h_all + b1_ref[...], 0.0)          # (R, 3H)

    h1 = h_all[0:B, 0:Hh]                                  # image hidden   (B, H)
    ha = h_all[B + B * T:B + B * T + B, 2 * Hh:3 * Hh]     # audio hidden   (B, H)

    # temporal mean over per-frame hiddens; frames are b-major -> each batch's
    # T rows are contiguous (static unroll, B tiny)
    hf_rows = []
    for b in range(B):
        blk = h_all[B + b * T:B + (b + 1) * T, Hh:2 * Hh]  # (T, H) contiguous rows
        hf_rows.append(jnp.sum(blk, axis=0, keepdims=True))
    hf = jnp.concatenate(hf_rows, axis=0) * (1.0 / T)      # video hidden   (B, H)

    # ---- block-diagonal head: ONE MXU dot computes V_S, V_T, V_A -------------
    z = jnp.zeros((B, Hh), f32)
    hblk = jnp.concatenate(
        [
            jnp.concatenate([h1, z, z], axis=1),
            jnp.concatenate([z, hf, z], axis=1),
            jnp.concatenate([z, z, ha], axis=1),
        ],
        axis=0,
    ).astype(bf16)                                         # (3B, 3H)
    vhead = jnp.dot(hblk, w2_ref[...], preferred_element_type=f32)   # (3B, c)

    b2 = b2_ref[...]
    v_s = vhead[0:B] + b2[0:1, :]
    v_t = vhead[B:2 * B] + b2[1:2, :]
    v_a = vhead[2 * B:3 * B] + b2[2:3, :]

    # ---- MoE gate: 3 lane reductions on (B, 3c), kept off the MXU ------------
    vcat = jnp.concatenate([v_s, v_t, v_a], axis=1)        # (B, 3c)
    wg = wg_ref[...]                                       # (3, 3c)
    bg = bg_ref[...]                                       # (3, 1)

    def gate_logit(j):
        return jnp.sum(vcat * wg[j:j + 1, :], axis=-1, keepdims=True) + bg[j:j + 1, :]

    g0, g1, g2 = gate_logit(0), gate_logit(1), gate_logit(2)   # each (B, 1)
    gm = jnp.maximum(jnp.maximum(g0, g1), g2)
    p0 = jnp.exp(g0 - gm)
    p1 = jnp.exp(g1 - gm)
    p2 = jnp.exp(g2 - gm)
    # exact reciprocal so gate0+gate1+gate2 == 1 and the "mix before the shared
    # expert FC" rewrite below stays algebraically identical.
    inv = pl.reciprocal(p0 + p1 + p2, approx=False)
    gate0, gate1, gate2 = p0 * inv, p1 * inv, p2 * inv

    # Shared expert FC is linear and the gate sums to 1, so mixing BEFORE the
    # expert matmul is identical and needs 1 MXU dot instead of 3.
    v_mix = gate0 * v_s + gate1 * v_t + gate2 * v_a        # (B, c) f32
    mixed = jnp.dot(v_mix.astype(bf16), we_ref[...],
                    preferred_element_type=f32) + be_ref[...]

    # ---- final nn.Softmax(dim=1) over the c logits ---------------------------
    mm = jnp.max(mixed, axis=-1, keepdims=True)
    em = jnp.exp(mixed - mm)
    den = jnp.sum(em, axis=-1, keepdims=True)
    out_ref[...] = em * pl.reciprocal(den, approx=False)


def pack_params(params):
    """One-time weight packing (concat / transpose / bf16 cast) outside the
    per-call path.  Returns the operand tuple consumed by the kernel."""
    (w1s, b1s, w2s, b2s,
     wf, bfr, w2t, b2t,
     wa1, ba1, wa2, ba2,
     wg, bg, we, be) = params

    bf16 = jnp.bfloat16
    Fi = w1s.shape[0]
    Fa = wa1.shape[0]
    c = we.shape[1]
    assert Fa <= Fi, "audio feature dim must not exceed image feature dim for K-fusion"

    wa1_pad = jnp.pad(wa1, ((0, Fi - Fa), (0, 0)))                    # (Fi, H)
    w1all = jnp.concatenate([w1s, wf, wa1_pad], axis=1).astype(bf16)  # (Fi, 3H)
    b1all = jnp.concatenate([b1s, bfr, ba1], axis=1)                  # (1, 3H) f32

    w2all = jnp.concatenate([w2s, w2t, wa2], axis=0).astype(bf16)     # (3H, c)
    b2all = jnp.concatenate([b2s, b2t, ba2], axis=0)                  # (3, c) f32

    wg3 = jnp.transpose(wg)                                           # (3, 3c) f32
    bg3 = jnp.transpose(bg)                                           # (3, 1) f32

    packed = (w1all, b1all, w2all, b2all, wg3, bg3, we.astype(bf16), be)
    return jax.tree_util.tree_map(jax.block_until_ready, packed)


@jax.jit
def three_stream_forward(image, frames, audio, packed):
    """image: (B, C, H, W); frames: (B, T, C, H, W); audio: (B, AF, AI).
    `packed` comes from pack_params (pre-cast / pre-concatenated weights)."""
    (w1all, b1all, w2all, b2all, wg3, bg3, we_bf, be) = packed

    bf16 = jnp.bfloat16
    B = image.shape[0]
    T = frames.shape[1]
    Fi = w1all.shape[0]
    H3 = w1all.shape[1]
    c = we_bf.shape[1]

    # Only activation packing happens per call: flatten, zero-pad audio to K=Fi,
    # stack rows [image | frames (natural b-major order) | audio], cast bf16.
    img_flat = image.reshape(B, -1)
    frm_flat = frames.reshape(B * T, -1)                    # no transpose: b-major rows
    aud_flat = audio.reshape(B, -1)
    Fa = aud_flat.shape[1]
    aud_pad = jnp.pad(aud_flat, ((0, 0), (0, Fi - Fa)))
    xall = jnp.concatenate([img_flat, frm_flat, aud_pad], axis=0).astype(bf16)  # (B*(T+2), Fi)

    operands = (xall, w1all, b1all, w2all, b2all, wg3, bg3, we_bf, be)

    R = B * (T + 2)
    flops = 2 * (R * Fi * H3 + 3 * B * H3 * c + B * c * c)
    transcendentals = B * (c + 8)
    bytes_accessed = sum(int(x.size) * x.dtype.itemsize for x in operands) + B * c * 4

    vmem_spec = pl.BlockSpec(memory_space=pltpu.MemorySpace.VMEM)

    # Single-shot problem: no grid -> every operand is one full VMEM block with
    # no double-buffering.
    return pl.pallas_call(
        three_stream_kernel,
        out_shape=jax.ShapeDtypeStruct((B, c), jnp.float32),
        in_specs=[vmem_spec] * len(operands),
        out_specs=vmem_spec,
        cost_estimate=pl.CostEstimate(
            flops=int(flops),
            transcendentals=int(transcendentals),
            bytes_accessed=int(bytes_accessed),
        ),
    )(*operands)


def init_params(key, img_feat, aud_feat, hidden, c):
    """Deterministic raw parameter init (biases kept 2-D: (1, n)); stored in f32."""
    ks = jax.random.split(key, 8)

    def w(k, shape, fan_in):
        return (jax.random.normal(k, shape, jnp.float32) * (1.0 / jnp.sqrt(fan_in))).astype(jnp.float32)

    params = (
        # stream1 (image "ResNet" stand-in MLP)
        w(ks[0], (img_feat, hidden), img_feat), jnp.zeros((1, hidden), jnp.float32),
        w(ks[1], (hidden, c), hidden),          jnp.zeros((1, c), jnp.float32),
        # stream2 (shared per-frame FC, then fusion FC)
        w(ks[2], (img_feat, hidden), img_feat), jnp.zeros((1, hidden), jnp.float32),
        w(ks[3], (hidden, c), hidden),          jnp.zeros((1, c), jnp.float32),
        # stream3 (audio FC net)
        w(ks[4], (aud_feat, hidden), aud_feat), jnp.zeros((1, hidden), jnp.float32),
        w(ks[5], (hidden, c), hidden),          jnp.zeros((1, c), jnp.float32),
        # MoE: gate over 3 experts from concatenated features, shared expert FC
        w(ks[6], (3 * c, 3), 3 * c),            jnp.zeros((1, 3), jnp.float32),
        w(ks[7], (c, c), c),                    jnp.zeros((1, c), jnp.float32),
    )
    return params


if __name__ == "__main__":
    key = jax.random.PRNGKey(0)
    k_img, k_frm, k_aud, k_par = jax.random.split(key, 4)

    # Small shapes consistent with the module's forward:
    B, C, H, W = 2, 4, 16, 16        # image  (NCHW)
    T = 3                            # SlowFusion video model built with 3 frames
    AUDIO_FRAME_COUNT, AUDIO_INPUT_SIZE = 8, 32
    NUM_CLASSES = 32                 # "c" passed to every stream and the MoE
    HIDDEN = 64                      # -> fused first-layer N = 3*HIDDEN = 192 lanes

    image = jax.random.normal(k_img, (B, C, H, W), jnp.float32)
    frames = jax.random.normal(k_frm, (B, T, C, H, W), jnp.float32)
    audio = jax.random.normal(k_aud, (B, AUDIO_FRAME_COUNT, AUDIO_INPUT_SIZE), jnp.float32)

    raw_params = init_params(
        k_par,
        img_feat=C * H * W,
        aud_feat=AUDIO_FRAME_COUNT * AUDIO_INPUT_SIZE,
        hidden=HIDDEN,
        c=NUM_CLASSES,
    )
    packed = pack_params(raw_params)     # one-time weight packing (off the hot path)

    out = three_stream_forward(image, frames, audio, packed)
    out = jax.block_until_ready(out)

    assert out.shape == (B, NUM_CLASSES)
    assert bool(jnp.all(jnp.isfinite(out)))
    assert jnp.allclose(jnp.sum(out, axis=1), 1.0, atol=1e-4)  # softmax rows sum to 1
    print("KERNEL_OK")
</pallas_src>

<mosaic_0001>
module attributes {stable_mosaic.version = 11 : i64} {
  func.func @three_stream_kernel(%arg0: memref<10x1024xbf16, #tpu.memory_space<vmem>>, %arg1: memref<1024x192xbf16, #tpu.memory_space<vmem>>, %arg2: memref<1x192xf32, #tpu.memory_space<vmem>>, %arg3: memref<192x32xbf16, #tpu.memory_space<vmem>>, %arg4: memref<3x32xf32, #tpu.memory_space<vmem>>, %arg5: memref<3x96xf32, #tpu.memory_space<vmem>>, %arg6: memref<3x1xf32, #tpu.memory_space<vmem>>, %arg7: memref<32x32xbf16, #tpu.memory_space<vmem>>, %arg8: memref<1x32xf32, #tpu.memory_space<vmem>>, %arg9: memref<2x32xf32, #tpu.memory_space<vmem>>) attributes {dimension_semantics = [], scalar_prefetch = 0 : i64, scratch_operands = 0 : i64, tpu.core_type = #tpu.core_type<tc>} {
    %c0 = arith.constant 0 : index
    %c0_0 = arith.constant 0 : index
    %0 = vector.load %arg0[%c0, %c0_0] : memref<10x1024xbf16, #tpu.memory_space<vmem>>, vector<10x1024xbf16>
    %c0_1 = arith.constant 0 : index
    %c0_2 = arith.constant 0 : index
    %1 = vector.load %arg1[%c0_1, %c0_2] : memref<1024x192xbf16, #tpu.memory_space<vmem>>, vector<1024x192xbf16>
    %cst = arith.constant dense<0.000000e+00> : vector<10x192xf32>
    %2 = tpu.matmul %0, %1, %cst {dimension_numbers = #tpu.dot_dimension_numbers<[1], [0], [0], [1], [0, 0, 1, 1], [], []>} : vector<10x1024xbf16>, vector<1024x192xbf16>, vector<10x192xf32> -> vector<10x192xf32>
    %c0_3 = arith.constant 0 : index
    %c0_4 = arith.constant 0 : index
    %3 = vector.load %arg2[%c0_3, %c0_4] : memref<1x192xf32, #tpu.memory_space<vmem>>, vector<1x192xf32>
    %4 = vector.broadcast %3 : vector<1x192xf32> to vector<10x192xf32>
    %5 = arith.addf %2, %4 : vector<10x192xf32>
    %cst_5 = arith.constant 0.000000e+00 : f32
    %6 = vector.broadcast %cst_5 : f32 to vector<10x192xf32>
    %7 = arith.maximumf %5, %6 : vector<10x192xf32>
    %8 = vector.extract_strided_slice %7 {offsets = [0, 0], sizes = [2, 64], strides = [1, 1]} : vector<10x192xf32> to vector<2x64xf32>
    %9 = vector.extract_strided_slice %7 {offsets = [8, 128], sizes = [2, 64], strides = [1, 1]} : vector<10x192xf32> to vector<2x64xf32>
    %10 = vector.extract_strided_slice %7 {offsets = [2, 64], sizes = [3, 64], strides = [1, 1]} : vector<10x192xf32> to vector<3x64xf32>
    %cst_6 = arith.constant dense<0.000000e+00> : vector<64xf32>
    %11 = vector.multi_reduction <add>, %10, %cst_6 [0] : vector<3x64xf32> to vector<64xf32>
    %12 = vector.shape_cast %11 : vector<64xf32> to vector<1x64xf32>
    %13 = vector.extract_strided_slice %7 {offsets = [5, 64], sizes = [3, 64], strides = [1, 1]} : vector<10x192xf32> to vector<3x64xf32>
    %cst_7 = arith.constant dense<0.000000e+00> : vector<64xf32>
    %14 = vector.multi_reduction <add>, %13, %cst_7 [0] : vector<3x64xf32> to vector<64xf32>
    %15 = vector.shape_cast %14 : vector<64xf32> to vector<1x64xf32>
    %16 = tpu.concatenate %12, %15 in 0 : vector<1x64xf32>, vector<1x64xf32> -> vector<2x64xf32>
    %cst_8 = arith.constant 0.333333343 : f32
    %17 = vector.broadcast %cst_8 : f32 to vector<2x64xf32>
    %18 = arith.mulf %16, %17 : vector<2x64xf32>
    %cst_9 = arith.constant 0.000000e+00 : f32
    %19 = vector.broadcast %cst_9 : f32 to vector<2x64xf32>
    %20 = tpu.concatenate %8, %19, %19 in 1 : vector<2x64xf32>, vector<2x64xf32>, vector<2x64xf32> -> vector<2x192xf32>
    %21 = tpu.concatenate %19, %18, %19 in 1 : vector<2x64xf32>, vector<2x64xf32>, vector<2x64xf32> -> vector<2x192xf32>
    %22 = tpu.concatenate %19, %19, %9 in 1 : vector<2x64xf32>, vector<2x64xf32>, vector<2x64xf32> -> vector<2x192xf32>
    %23 = tpu.concatenate %20, %21, %22 in 0 : vector<2x192xf32>, vector<2x192xf32>, vector<2x192xf32> -> vector<6x192xf32>
    %24 = arith.truncf %23 : vector<6x192xf32> to vector<6x192xbf16>
    %c0_10 = arith.constant 0 : index
    %c0_11 = arith.constant 0 : index
    %25 = vector.load %arg3[%c0_10, %c0_11] : memref<192x32xbf16, #tpu.memory_space<vmem>>, vector<192x32xbf16>
    %cst_12 = arith.constant dense<0.000000e+00> : vector<6x32xf32>
    %26 = tpu.matmul %24, %25, %cst_12 {dimension_numbers = #tpu.dot_dimension_numbers<[1], [0], [0], [1], [0, 0, 1, 1], [], []>} : vector<6x192xbf16>, vector<192x32xbf16>, vector<6x32xf32> -> vector<6x32xf32>
    %c0_13 = arith.constant 0 : index
    %c0_14 = arith.constant 0 : index
    %27 = vector.load %arg4[%c0_13, %c0_14] : memref<3x32xf32, #tpu.memory_space<vmem>>, vector<3x32xf32>
    %28 = vector.extract_strided_slice %26 {offsets = [0, 0], sizes = [2, 32], strides = [1, 1]} : vector<6x32xf32> to vector<2x32xf32>
    %29 = vector.extract_strided_slice %27 {offsets = [0, 0], sizes = [1, 32], strides = [1, 1]} : vector<3x32xf32> to vector<1x32xf32>
    %30 = vector.broadcast %29 : vector<1x32xf32> to vector<2x32xf32>
    %31 = arith.addf %28, %30 : vector<2x32xf32>
    %32 = vector.extract_strided_slice %26 {offsets = [2, 0], sizes = [2, 32], strides = [1, 1]} : vector<6x32xf32> to vector<2x32xf32>
    %33 = vector.extract_strided_slice %27 {offsets = [1, 0], sizes = [1, 32], strides = [1, 1]} : vector<3x32xf32> to vector<1x32xf32>
    %34 = vector.broadcast %33 : vector<1x32xf32> to vector<2x32xf32>
    %35 = arith.addf %32, %34 : vector<2x32xf32>
    %36 = vector.extract_strided_slice %26 {offsets = [4, 0], sizes = [2, 32], strides = [1, 1]} : vector<6x32xf32> to vector<2x32xf32>
    %37 = vector.extract_strided_slice %27 {offsets = [2, 0], sizes = [1, 32], strides = [1, 1]} : vector<3x32xf32> to vector<1x32xf32>
    %38 = vector.broadcast %37 : vector<1x32xf32> to vector<2x32xf32>
    %39 = arith.addf %36, %38 : vector<2x32xf32>
    %40 = tpu.concatenate %31, %35, %39 in 1 : vector<2x32xf32>, vector<2x32xf32>, vector<2x32xf32> -> vector<2x96xf32>
    %c0_15 = arith.constant 0 : index
    %c0_16 = arith.constant 0 : index
    %41 = vector.load %arg5[%c0_15, %c0_16] : memref<3x96xf32, #tpu.memory_space<vmem>>, vector<3x96xf32>
    %c0_17 = arith.constant 0 : index
    %c0_18 = arith.constant 0 : index
    %42 = vector.load %arg6[%c0_17, %c0_18] : memref<3x1xf32, #tpu.memory_space<vmem>>, vector<3x1xf32>
    %43 = vector.extract_strided_slice %41 {offsets = [0, 0], sizes = [1, 96], strides = [1, 1]} : vector<3x96xf32> to vector<1x96xf32>
    %44 = vector.broadcast %43 : vector<1x96xf32> to vector<2x96xf32>
    %45 = arith.mulf %40, %44 : vector<2x96xf32>
    %cst_19 = arith.constant dense<0.000000e+00> : vector<2xf32>
    %46 = vector.multi_reduction <add>, %45, %cst_19 [1] : vector<2x96xf32> to vector<2xf32>
    %47 = vector.shape_cast %46 : vector<2xf32> to vector<2x1xf32>
    %48 = vector.extract_strided_slice %42 {offsets = [0, 0], sizes = [1, 1], strides = [1, 1]} : vector<3x1xf32> to vector<1x1xf32>
    %49 = vector.broadcast %48 : vector<1x1xf32> to vector<2x1xf32>
    %50 = arith.addf %47, %49 : vector<2x1xf32>
    %51 = vector.extract_strided_slice %41 {offsets = [1, 0], sizes = [1, 96], strides = [1, 1]} : vector<3x96xf32> to vector<1x96xf32>
    %52 = vector.broadcast %51 : vector<1x96xf32> to vector<2x96xf32>
    %53 = arith.mulf %40, %52 : vector<2x96xf32>
    %cst_20 = arith.constant dense<0.000000e+00> : vector<2xf32>
    %54 = vector.multi_reduction <add>, %53, %cst_20 [1] : vector<2x96xf32> to vector<2xf32>
    %55 = vector.shape_cast %54 : vector<2xf32> to vector<2x1xf32>
    %56 = vector.extract_strided_slice %42 {offsets = [1, 0], sizes = [1, 1], strides = [1, 1]} : vector<3x1xf32> to vector<1x1xf32>
    %57 = vector.broadcast %56 : vector<1x1xf32> to vector<2x1xf32>
    %58 = arith.addf %55, %57 : vector<2x1xf32>
    %59 = vector.extract_strided_slice %41 {offsets = [2, 0], sizes = [1, 96], strides = [1, 1]} : vector<3x96xf32> to vector<1x96xf32>
    %60 = vector.broadcast %59 : vector<1x96xf32> to vector<2x96xf32>
    %61 = arith.mulf %40, %60 : vector<2x96xf32>
    %cst_21 = arith.constant dense<0.000000e+00> : vector<2xf32>
    %62 = vector.multi_reduction <add>, %61, %cst_21 [1] : vector<2x96xf32> to vector<2xf32>
    %63 = vector.shape_cast %62 : vector<2xf32> to vector<2x1xf32>
    %64 = vector.extract_strided_slice %42 {offsets = [2, 0], sizes = [1, 1], strides = [1, 1]} : vector<3x1xf32> to vector<1x1xf32>
    %65 = vector.broadcast %64 : vector<1x1xf32> to vector<2x1xf32>
    %66 = arith.addf %63, %65 : vector<2x1xf32>
    %67 = arith.maximumf %50, %58 : vector<2x1xf32>
    %68 = arith.maximumf %67, %66 : vector<2x1xf32>
    %69 = arith.subf %50, %68 : vector<2x1xf32>
    %70 = math.exp %69 : vector<2x1xf32>
    %71 = arith.subf %58, %68 : vector<2x1xf32>
    %72 = math.exp %71 : vector<2x1xf32>
    %73 = arith.subf %66, %68 : vector<2x1xf32>
    %74 = math.exp %73 : vector<2x1xf32>
    %75 = arith.addf %70, %72 : vector<2x1xf32>
    %76 = arith.addf %75, %74 : vector<2x1xf32>
    %77 = tpu.reciprocal %76 : vector<2x1xf32> -> vector<2x1xf32>
    %78 = arith.mulf %70, %77 : vector<2x1xf32>
    %79 = arith.mulf %72, %77 : vector<2x1xf32>
    %80 = arith.mulf %74, %77 : vector<2x1xf32>
    %81 = vector.broadcast %78 : vector<2x1xf32> to vector<2x32xf32>
    %82 = arith.mulf %81, %31 : vector<2x32xf32>
    %83 = vector.broadcast %79 : vector<2x1xf32> to vector<2x32xf32>
    %84 = arith.mulf %83, %35 : vector<2x32xf32>
    %85 = arith.addf %82, %84 : vector<2x32xf32>
    %86 = vector.broadcast %80 : vector<2x1xf32> to vector<2x32xf32>
    %87 = arith.mulf %86, %39 : vector<2x32xf32>
    %88 = arith.addf %85, %87 : vector<2x32xf32>
    %89 = arith.truncf %88 : vector<2x32xf32> to vector<2x32xbf16>
    %c0_22 = arith.constant 0 : index
    %c0_23 = arith.constant 0 : index
    %90 = vector.load %arg7[%c0_22, %c0_23] : memref<32x32xbf16, #tpu.memory_space<vmem>>, vector<32x32xbf16>
    %cst_24 = arith.constant dense<0.000000e+00> : vector<2x32xf32>
    %91 = tpu.matmul %89, %90, %cst_24 {dimension_numbers = #tpu.dot_dimension_numbers<[1], [0], [0], [1], [0, 0, 1, 1], [], []>} : vector<2x32xbf16>, vector<32x32xbf16>, vector<2x32xf32> -> vector<2x32xf32>
    %c0_25 = arith.constant 0 : index
    %c0_26 = arith.constant 0 : index
    %92 = vector.load %arg8[%c0_25, %c0_26] : memref<1x32xf32, #tpu.memory_space<vmem>>, vector<1x32xf32>
    %93 = vector.broadcast %92 : vector<1x32xf32> to vector<2x32xf32>
    %94 = arith.addf %91, %93 : vector<2x32xf32>
    %cst_27 = arith.constant dense<0xFF800000> : vector<2xf32>
    %95 = vector.multi_reduction <maximumf>, %94, %cst_27 [1] : vector<2x32xf32> to vector<2xf32>
    %96 = vector.shape_cast %95 : vector<2xf32> to vector<2x1xf32>
    %97 = vector.broadcast %96 : vector<2x1xf32> to vector<2x32xf32>
    %98 = arith.subf %94, %97 : vector<2x32xf32>
    %99 = math.exp %98 : vector<2x32xf32>
    %cst_28 = arith.constant dense<0.000000e+00> : vector<2xf32>
    %100 = vector.multi_reduction <add>, %99, %cst_28 [1] : vector<2x32xf32> to vector<2xf32>
    %101 = vector.shape_cast %100 : vector<2xf32> to vector<2x1xf32>
    %102 = tpu.reciprocal %101 : vector<2x1xf32> -> vector<2x1xf32>
    %103 = vector.broadcast %102 : vector<2x1xf32> to vector<2x32xf32>
    %104 = arith.mulf %99, %103 : vector<2x32xf32>
    %c0_29 = arith.constant 0 : index
    %c0_30 = arith.constant 0 : index
    %105 = vector.load %arg9[%c0_29, %c0_30] : memref<2x32xf32, #tpu.memory_space<vmem>>, vector<2x32xf32>
    tpu.vector_store %arg9[%c0_29, %c0_30], %104 {strides = array<i32>} : memref<2x32xf32, #tpu.memory_space<vmem>>, vector<2x32xf32>,
    return
  }
}

</mosaic_0001>

<bundles_post_ra>
// kernel: three_stream_forward.1
= control target key start
LH: loop header
LB: loop body
LE: loop exit
PB: predicated region body
PF: predicated region fallthrough
CT: control target
= control target key end

     0   :  { %v1842_v8 = vmov 0   ;;  %s2453_s0 = inlined_call_operand.vmem [shape: bf16[10,1024], index: 0, kind: input, shape index: {}]   ;;  %s2454_s1 = inlined_call_operand.vmem [shape: bf16[1024,192], index: 1, kind: input, shape index: {}]   ;;  %s2455_s2 = inlined_call_operand.vmem [shape: f32[1,192], index: 2, kind: input, shape index: {}]   ;;  %s2456_s3 = inlined_call_operand.vmem [shape: bf16[192,32], index: 3, kind: input, shape index: {}]   ;;  %s2457_s4 = inlined_call_operand.vmem [shape: f32[3,32], index: 4, kind: input, shape index: {}]   ;;  %s2458_s5 = inlined_call_operand.vmem [shape: f32[3,96], index: 5, kind: input, shape index: {}]   ;;  %s2459_s6 = inlined_call_operand.vmem [shape: f32[3,1], index: 6, kind: input, shape index: {}]   ;;  %s2460_s7 = inlined_call_operand.vmem [shape: bf16[32,32], index: 7, kind: input, shape index: {}]   ;;  %s2461_s8 = inlined_call_operand.vmem [shape: f32[1,32], index: 8, kind: input, shape index: {}]   ;;  %s2462_s9 = inlined_call_operand.hbm [shape: f32[2,32], index: 9, kind: output, shape index: {}]  }
   0x1   :  { %v1600_v0 = vld [vmem:[%s2454_s1 + $0x4] ss:$8 sps:$4 sm:$0xff]   ;;  %v1604_v2 = vld [vmem:[%s2454_s1] ss:$8 sps:$4 sm:$0xff]   ;;  %v1606_v4 = vld [vmem:[%s2454_s1 + $0x14] ss:$8 sps:$4 sm:$0xff]   ;;  %1598 = vset.pattern.permute.xlu1 %v1842_v8  ;;  %1599 = vset.pattern.permute.xlu0 %v1842_v8 }
   0x2   :  { %v1602_v1 = vld [vmem:[%s2454_s1 + $0x204] ss:$8 sps:$4 sm:$0xff]   ;;  %862 = vmatprep.subr.bf16.mxu1 %v1600_v0  ;;  %v1605_v3 = vld [vmem:[%s2454_s1 + $0x200] ss:$8 sps:$4 sm:$0xff]   ;;  %v1608_v5 = vld [vmem:[%s2454_s1 + $0x214] ss:$8 sps:$4 sm:$0xff]  }
   0x3   :  { %944 = vmatprep.subr.bf16.mxu0 %v1602_v1  ;;  %863 = vmatpush1.bf16.msra.mxu1 %v1604_v2  ;;  %v1610_v6 = vld [vmem:[%s2454_s1 + $0x10] ss:$8 sps:$4 sm:$0xff]   ;;  %v1612_v9 = vld [vmem:[%s2454_s1 + $0x24] ss:$8 sps:$4 sm:$0xff]   ;;  %v1616_v11 = vld [vmem:[%s2454_s1 + $0x20] ss:$8 sps:$4 sm:$0xff]  }
   0x4   :  { %945 = vmatpush1.bf16.msra.mxu0 %v1605_v3  ;;  %864 = vmatprep.subr.bf16.mxu1 %v1606_v4  ;;  %v1611_v7 = vld [vmem:[%s2454_s1 + $0x210] ss:$8 sps:$4 sm:$0xff]   ;;  %v1614_v10 = vld [vmem:[%s2454_s1 + $0x224] ss:$8 sps:$4 sm:$0xff]   ;;  %v1617_v12 = vld [vmem:[%s2454_s1 + $0x220] ss:$8 sps:$4 sm:$0xff]  }
   0x5   :  { %946 = vmatprep.subr.bf16.mxu0 %v1608_v5  ;;  %v1618_v13 = vld [vmem:[%s2454_s1 + $0x34] ss:$8 sps:$4 sm:$0xff]   ;;  %v1622_v15 = vld [vmem:[%s2454_s1 + $0x30] ss:$8 sps:$4 sm:$0xff]   ;;  %v1624_v17 = vld [vmem:[%s2454_s1 + $0x44] ss:$8 sps:$4 sm:$0xff]  }
   0x6   :  { %v1620_v14 = vld [vmem:[%s2454_s1 + $0x234] ss:$8 sps:$4 sm:$0xff]   ;;  %v1623_v16 = vld [vmem:[%s2454_s1 + $0x230] ss:$8 sps:$4 sm:$0xff]   ;;  %v1626_v18 = vld [vmem:[%s2454_s1 + $0x244] ss:$8 sps:$4 sm:$0xff]  }
   0x7   :  { %865 = vmatpush1.bf16.msra.mxu1 %v1610_v6  ;;  %v1628_v19 = vld [vmem:[%s2454_s1 + $0x40] ss:$8 sps:$4 sm:$0xff]   ;;  %v1630_v21 = vld [vmem:[%s2454_s1 + $0x54] ss:$8 sps:$4 sm:$0xff]   ;;  %v1634_v23 = vld [vmem:[%s2454_s1 + $0x50] ss:$8 sps:$4 sm:$0xff]  }
   0x8   :  { %947 = vmatpush1.bf16.msra.mxu0 %v1611_v7  ;;  %866 = vmatprep.subr.bf16.mxu1 %v1612_v9  ;;  %v1629_v20 = vld [vmem:[%s2454_s1 + $0x240] ss:$8 sps:$4 sm:$0xff]   ;;  %v1632_v22 = vld [vmem:[%s2454_s1 + $0x254] ss:$8 sps:$4 sm:$0xff]   ;;  %v1635_v24 = vld [vmem:[%s2454_s1 + $0x250] ss:$8 sps:$4 sm:$0xff]  }
   0x9   :  { %948 = vmatprep.subr.bf16.mxu0 %v1614_v10  ;;  %v1636_v25 = vld [vmem:[%s2454_s1 + $0x64] ss:$8 sps:$4 sm:$0xff]   ;;  %v1640_v27 = vld [vmem:[%s2454_s1 + $0x60] ss:$8 sps:$4 sm:$0xff]   ;;  %v1642_v29 = vld [vmem:[%s2454_s1 + $0x74] ss:$8 sps:$4 sm:$0xff]  }
   0xa   :  { %v1638_v26 = vld [vmem:[%s2454_s1 + $0x264] ss:$8 sps:$4 sm:$0xff]   ;;  %v1641_v28 = vld [vmem:[%s2454_s1 + $0x260] ss:$8 sps:$4 sm:$0xff]   ;;  %v1644_v30 = vld [vmem:[%s2454_s1 + $0x274] ss:$8 sps:$4 sm:$0xff]  }
   0xb   :  { %867 = vmatpush1.bf16.msra.mxu1 %v1616_v11  ;;  %v1646_v31 = vld [vmem:[%s2454_s1 + $0x70] ss:$8 sps:$4 sm:$0xff]   ;;  %v1648_v33 = vld [vmem:[%s2454_s1 + $0x84] ss:$8 sps:$4 sm:$0xff]   ;;  %v1652_v35 = vld [vmem:[%s2454_s1 + $0x80] ss:$8 sps:$4 sm:$0xff]  }
   0xc   :  { %949 = vmatpush1.bf16.msra.mxu0 %v1617_v12  ;;  %868 = vmatprep.subr.bf16.mxu1 %v1618_v13  ;;  %v1647_v32 = vld [vmem:[%s2454_s1 + $0x270] ss:$8 sps:$4 sm:$0xff]   ;;  %v1650_v34 = vld [vmem:[%s2454_s1 + $0x284] ss:$8 sps:$4 sm:$0xff]   ;;  %v1653_v36 = vld [vmem:[%s2454_s1 + $0x280] ss:$8 sps:$4 sm:$0xff]  }
   0xd   :  { %950 = vmatprep.subr.bf16.mxu0 %v1620_v14  ;;  %v1654_v37 = vld [vmem:[%s2454_s1 + $0x94] ss:$8 sps:$4 sm:$0xff]   ;;  %v1658_v39 = vld [vmem:[%s2454_s1 + $0x90] ss:$8 sps:$4 sm:$0xff]   ;;  %v1660_v41 = vld [vmem:[%s2454_s1 + $0xa4] ss:$8 sps:$4 sm:$0xff]  }
   0xe   :  { %v1656_v38 = vld [vmem:[%s2454_s1 + $0x294] ss:$8 sps:$4 sm:$0xff]   ;;  %v1659_v40 = vld [vmem:[%s2454_s1 + $0x290] ss:$8 sps:$4 sm:$0xff]   ;;  %v1662_v42 = vld [vmem:[%s2454_s1 + $0x2a4] ss:$8 sps:$4 sm:$0xff]  }
   0xf   :  { %869 = vmatpush1.bf16.msra.mxu1 %v1622_v15  ;;  %v1664_v43 = vld [vmem:[%s2454_s1 + $0xa0] ss:$8 sps:$4 sm:$0xff]   ;;  %v1666_v45 = vld [vmem:[%s2454_s1 + $0xb4] ss:$8 sps:$4 sm:$0xff]   ;;  %v1670_v47 = vld [vmem:[%s2454_s1 + $0xb0] ss:$8 sps:$4 sm:$0xff]  }
  0x10   :  { %951 = vmatpush1.bf16.msra.mxu0 %v1623_v16  ;;  %870 = vmatprep.subr.bf16.mxu1 %v1624_v17  ;;  %v1665_v44 = vld [vmem:[%s2454_s1 + $0x2a0] ss:$8 sps:$4 sm:$0xff]   ;;  %v1668_v46 = vld [vmem:[%s2454_s1 + $0x2b4] ss:$8 sps:$4 sm:$0xff]   ;;  %v1671_v48 = vld [vmem:[%s2454_s1 + $0x2b0] ss:$8 sps:$4 sm:$0xff]  }
  0x11   :  { %952 = vmatprep.subr.bf16.mxu0 %v1626_v18  ;;  %v34_v49 = vld [vmem:[%s2453_s0] sm:$0xff]  ;;  %v36_v54 = vld [vmem:[%s2453_s0 + $0x10] sm:$0xff] }
  0x12   :  { %v38_v50 = vld [vmem:[%s2453_s0 + $0x20] sm:$0x11]  ;;  %v40_v55 = vld [vmem:[%s2453_s0 + $0x30] sm:$0x11] }
  0x13   :  { %871 = vmatpush1.bf16.msra.mxu1 %v1628_v19  ;;  %v1672_v51 = vld [vmem:[%s2454_s1 + $0xc4] ss:$8 sps:$4 sm:$0xff]   ;;  %v1417_v53 = vcombine.high %v34_v49, %v38_v50  ;;  %v1421_v56 = vcombine.high %v36_v54, %v40_v55  ;;  %v1676_v57 = vld [vmem:[%s2454_s1 + $0xc0] ss:$8 sps:$4 sm:$0xff]   ;;  %v1678_v59 = vld [vmem:[%s2454_s1 + $0xd4] ss:$8 sps:$4 sm:$0xff]   ;;  %v1416_v10 = vcombine.low %v34_v49, %v38_v50  ;;  %v1420_v12 = vcombine.low %v36_v54, %v40_v55 }
  0x14   :  { %953 = vmatpush1.bf16.msra.mxu0 %v1629_v20  ;;  %872 = vmatprep.subr.bf16.mxu1 %v1630_v21  ;;  %v1674_v52 = vld [vmem:[%s2454_s1 + $0x2c4] ss:$8 sps:$4 sm:$0xff]   ;;  %v1677_v58 = vld [vmem:[%s2454_s1 + $0x2c0] ss:$8 sps:$4 sm:$0xff]   ;;  %v1680_v60 = vld [vmem:[%s2454_s1 + $0x2d4] ss:$8 sps:$4 sm:$0xff]  }
  0x15   :  { %954 = vmatprep.subr.bf16.mxu0 %v1632_v22  ;;  %894 = vmatprep.mubr.bf16.mxu1 %v1417_v53  ;;  %v1682_v61 = vld [vmem:[%s2454_s1 + $0xd0] ss:$8 sps:$4 sm:$0xff]   ;;  %v1684_v63 = vld [vmem:[%s2454_s1 + $0xe4] ss:$8 sps:$4 sm:$0xff]   ;;  %v1688_v1 = vld [vmem:[%s2454_s1 + $0xe0] ss:$8 sps:$4 sm:$0xff]  }
  0x16   :  { %976 = vmatprep.mubr.bf16.mxu0 %v1421_v56  ;;  %v1683_v62 = vld [vmem:[%s2454_s1 + $0x2d0] ss:$8 sps:$4 sm:$0xff]   ;;  %v1686_v0 = vld [vmem:[%s2454_s1 + $0x2e4] ss:$8 sps:$4 sm:$0xff]   ;;  %v1689_v2 = vld [vmem:[%s2454_s1 + $0x2e0] ss:$8 sps:$4 sm:$0xff]  }
  0x17   :  { %873 = vmatpush1.bf16.msra.mxu1 %v1634_v23  ;;  %v1690_v3 = vld [vmem:[%s2454_s1 + $0xf4] ss:$8 sps:$4 sm:$0xff]   ;;  %v1694_v5 = vld [vmem:[%s2454_s1 + $0xf0] ss:$8 sps:$4 sm:$0xff]   ;;  %v1698_v7 = vld [vmem:[%s2454_s1 + $0x104] ss:$8 sps:$4 sm:$0xff]  }
  0x18   :  { %955 = vmatpush1.bf16.msra.mxu0 %v1635_v24  ;;  %874 = vmatprep.subr.bf16.mxu1 %v1636_v25  ;;  %v1692_v4 = vld [vmem:[%s2454_s1 + $0x2f4] ss:$8 sps:$4 sm:$0xff]   ;;  %v1695_v6 = vld [vmem:[%s2454_s1 + $0x2f0] ss:$8 sps:$4 sm:$0xff]   ;;  %v1701_v9 = vld [vmem:[%s2454_s1 + $0x304] ss:$8 sps:$4 sm:$0xff]  }
  0x19   :  { %956 = vmatprep.subr.bf16.mxu0 %v1638_v26  ;;  %v1696_v11 = vld [vmem:[%s2454_s1 + $0x100] ss:$8 sps:$4 sm:$0xff]   ;;  %v1704_v14 = vld [vmem:[%s2454_s1 + $0x114] ss:$8 sps:$4 sm:$0xff]   ;;  %v1702_v16 = vld [vmem:[%s2454_s1 + $0x110] ss:$8 sps:$4 sm:$0xff]  }
  0x1a   :  { %v1699_v13 = vld [vmem:[%s2454_s1 + $0x300] ss:$8 sps:$4 sm:$0xff]   ;;  %v1707_v15 = vld [vmem:[%s2454_s1 + $0x314] ss:$8 sps:$4 sm:$0xff]   ;;  %v1705_v17 = vld [vmem:[%s2454_s1 + $0x310] ss:$8 sps:$4 sm:$0xff]  }
  0x1b   :  { %875 = vmatpush1.bf16.msra.mxu1 %v1640_v27  ;;  %v1710_v18 = vld [vmem:[%s2454_s1 + $0x124] ss:$8 sps:$4 sm:$0xff]   ;;  %v1708_v20 = vld [vmem:[%s2454_s1 + $0x120] ss:$8 sps:$4 sm:$0xff]   ;;  %v1716_v22 = vld [vmem:[%s2454_s1 + $0x134] ss:$8 sps:$4 sm:$0xff]  }
  0x1c   :  { %957 = vmatpush1.bf16.msra.mxu0 %v1641_v28  ;;  %876 = vmatprep.subr.bf16.mxu1 %v1642_v29  ;;  %v1713_v19 = vld [vmem:[%s2454_s1 + $0x324] ss:$8 sps:$4 sm:$0xff]   ;;  %v1711_v21 = vld [vmem:[%s2454_s1 + $0x320] ss:$8 sps:$4 sm:$0xff]   ;;  %v1719_v23 = vld [vmem:[%s2454_s1 + $0x334] ss:$8 sps:$4 sm:$0xff]  }
  0x1d   :  { %958 = vmatprep.subr.bf16.mxu0 %v1644_v30  ;;  %v1714_v24 = vld [vmem:[%s2454_s1 + $0x130] ss:$8 sps:$4 sm:$0xff]   ;;  %v1722_v26 = vld [vmem:[%s2454_s1 + $0x144] ss:$8 sps:$4 sm:$0xff]   ;;  %v1720_v28 = vld [vmem:[%s2454_s1 + $0x140] ss:$8 sps:$4 sm:$0xff]  }
  0x1e   :  { %v1717_v25 = vld [vmem:[%s2454_s1 + $0x330] ss:$8 sps:$4 sm:$0xff]   ;;  %v1725_v27 = vld [vmem:[%s2454_s1 + $0x344] ss:$8 sps:$4 sm:$0xff]   ;;  %v1723_v29 = vld [vmem:[%s2454_s1 + $0x340] ss:$8 sps:$4 sm:$0xff]  }
  0x1f   :  { %877 = vmatpush1.bf16.msra.mxu1 %v1646_v31  ;;  %v1728_v30 = vld [vmem:[%s2454_s1 + $0x154] ss:$8 sps:$4 sm:$0xff]   ;;  %v1749_v49 = vld [vmem:[%s2454_s1 + $0x384] ss:$8 sps:$4 sm:$0xff]   ;;  %v1744_v50 = vld [vmem:[%s2454_s1 + $0x180] ss:$8 sps:$4 sm:$0xff]  }
  0x20   :  { %959 = vmatpush1.bf16.msra.mxu0 %v1647_v32  ;;  %878 = vmatprep.subr.bf16.mxu1 %v1648_v33  ;;  %v1731_v31 = vld [vmem:[%s2454_s1 + $0x354] ss:$8 sps:$4 sm:$0xff]   ;;  %v1726_v32 = vld [vmem:[%s2454_s1 + $0x150] ss:$8 sps:$4 sm:$0xff]  }
  0x21   :  { %960 = vmatprep.subr.bf16.mxu0 %v1650_v34  ;;  %v1729_v33 = vld [vmem:[%s2454_s1 + $0x350] ss:$8 sps:$4 sm:$0xff]   ;;  %v1734_v34 = vld [vmem:[%s2454_s1 + $0x164] ss:$8 sps:$4 sm:$0xff]   ;;  %v1755_v53 = vld [vmem:[%s2454_s1 + $0x394] ss:$8 sps:$4 sm:$0xff]  }
  0x23   :  { %879 = vmatpush1.bf16.msra.mxu1 %v1652_v35  ;;  %v1737_v35 = vld [vmem:[%s2454_s1 + $0x364] ss:$8 sps:$4 sm:$0xff]  }
  0x24   :  { %961 = vmatpush1.bf16.msra.mxu0 %v1653_v36  ;;  %880 = vmatprep.subr.bf16.mxu1 %v1654_v37  ;;  %v1732_v36 = vld [vmem:[%s2454_s1 + $0x160] ss:$8 sps:$4 sm:$0xff]  }
  0x25   :  { %962 = vmatprep.subr.bf16.mxu0 %v1656_v38  ;;  %v1735_v37 = vld [vmem:[%s2454_s1 + $0x360] ss:$8 sps:$4 sm:$0xff]  }
  0x26   :  { %v2191_v38 = vld [vmem:[%s2453_s0 + $0x8] sm:$0xff] }
  0x27   :  { %881 = vmatpush1.bf16.msra.mxu1 %v1658_v39  ;;  %v2196_v39 = vld [vmem:[%s2453_s0 + $0x28] sm:$0x11] }
  0x28   :  { %963 = vmatpush1.bf16.msra.mxu0 %v1659_v40  ;;  %882 = vmatprep.subr.bf16.mxu1 %v1660_v41  ;;  %v2201_v40 = vld [vmem:[%s2453_s0 + $0x18] sm:$0xff] }
  0x29   :  { %964 = vmatprep.subr.bf16.mxu0 %v1662_v42  ;;  %v2206_v41 = vld [vmem:[%s2453_s0 + $0x38] sm:$0x11] }
  0x2a   :  { %v1740_v42 = vld [vmem:[%s2454_s1 + $0x174] ss:$8 sps:$4 sm:$0xff]  }
  0x2b   :  { %883 = vmatpush1.bf16.msra.mxu1 %v1664_v43  ;;  %v1419_v43 = vcombine.high %v2191_v38, %v2196_v39 }
  0x2c   :  { %965 = vmatpush1.bf16.msra.mxu0 %v1665_v44  ;;  %884 = vmatprep.subr.bf16.mxu1 %v1666_v45  ;;  %v1743_v44 = vld [vmem:[%s2454_s1 + $0x374] ss:$8 sps:$4 sm:$0xff]   ;;  %v1423_v45 = vcombine.high %v2201_v40, %v2206_v41 }
  0x2d   :  { %966 = vmatprep.subr.bf16.mxu0 %v1668_v46  ;;  %v1738_v46 = vld [vmem:[%s2454_s1 + $0x170] ss:$8 sps:$4 sm:$0xff]  }
  0x2f   :  { %885 = vmatpush1.bf16.msra.mxu1 %v1670_v47  ;;  %v1741_v47 = vld [vmem:[%s2454_s1 + $0x370] ss:$8 sps:$4 sm:$0xff]  }
  0x30   :  { %967 = vmatpush1.bf16.msra.mxu0 %v1671_v48  ;;  %886 = vmatprep.subr.bf16.mxu1 %v1672_v51  ;;  %v1746_v48 = vld [vmem:[%s2454_s1 + $0x184] ss:$8 sps:$4 sm:$0xff]   ;;  %v1747_v51 = vld [vmem:[%s2454_s1 + $0x380] ss:$8 sps:$4 sm:$0xff]  }
  0x31   :  { %968 = vmatprep.subr.bf16.mxu0 %v1674_v52  ;;  %v1752_v52 = vld [vmem:[%s2454_s1 + $0x194] ss:$8 sps:$4 sm:$0xff]  }
  0x33   :  { %887 = vmatpush1.bf16.msra.mxu1 %v1676_v57 }
  0x34   :  { %969 = vmatpush1.bf16.msra.mxu0 %v1677_v58  ;;  %888 = vmatprep.subr.bf16.mxu1 %v1678_v59 }
  0x35   :  { %970 = vmatprep.subr.bf16.mxu0 %v1680_v60 }
  0x37   :  { %889 = vmatpush1.bf16.msra.mxu1 %v1682_v61 }
  0x38   :  { %971 = vmatpush1.bf16.msra.mxu0 %v1683_v62  ;;  %890 = vmatprep.subr.bf16.mxu1 %v1684_v63 }
  0x39   :  { %972 = vmatprep.subr.bf16.mxu0 %v1686_v0 }
  0x3b   :  { %891 = vmatpush1.bf16.msra.mxu1 %v1688_v1 }
  0x3c   :  { %973 = vmatpush1.bf16.msra.mxu0 %v1689_v2  ;;  %892 = vmatprep.subr.bf16.mxu1 %v1690_v3 }
  0x3d   :  { %974 = vmatprep.subr.bf16.mxu0 %v1692_v4 }
  0x3f   :  { %893 = vmatpush1.bf16.msra.mxu1 %v1694_v5 }
  0x40   :  { %975 = vmatpush1.bf16.msra.mxu0 %v1695_v6  ;;  %903 = vmatprep.subr.bf16.mxu1 %v1698_v7 }
  0x41   :  { %985 = vmatprep.subr.bf16.mxu0 %v1701_v9 }
  0x42   :  { %895 = vmatmul.mubr.bf16.vlgmr.msra.gmra.mrb[0].mxu1 %v1416_v10 }
  0x43   :  { %977 = vmatmul.mubr.bf16.vlgmr.msra.gmra.mrb[0].mxu0 %v1420_v12  ;;  %904 = vmatpush1.bf16.msra.mxu1 %v1696_v11 }
  0x44   :  { %986 = vmatpush1.bf16.msra.mxu0 %v1699_v13  ;;  %905 = vmatprep.subr.bf16.mxu1 %v1704_v14 }
  0x45   :  { %987 = vmatprep.subr.bf16.mxu0 %v1707_v15  ;;  %935 = vmatprep.mubr.bf16.mxu1 %v1419_v43 }
  0x46   :  { %1017 = vmatprep.mubr.bf16.mxu0 %v1423_v45 }
  0x47   :  { %906 = vmatpush1.bf16.msra.mxu1 %v1702_v16 }
  0x48   :  { %988 = vmatpush1.bf16.msra.mxu0 %v1705_v17  ;;  %907 = vmatprep.subr.bf16.mxu1 %v1710_v18 }
  0x49   :  { %989 = vmatprep.subr.bf16.mxu0 %v1713_v19 }
  0x4b   :  { %908 = vmatpush1.bf16.msra.mxu1 %v1708_v20 }
  0x4c   :  { %990 = vmatpush1.bf16.msra.mxu0 %v1711_v21  ;;  %909 = vmatprep.subr.bf16.mxu1 %v1716_v22 }
  0x4d   :  { %991 = vmatprep.subr.bf16.mxu0 %v1719_v23 }
  0x4f   :  { %910 = vmatpush1.bf16.msra.mxu1 %v1714_v24 }
  0x50   :  { %992 = vmatpush1.bf16.msra.mxu0 %v1717_v25  ;;  %911 = vmatprep.subr.bf16.mxu1 %v1722_v26 }
  0x51   :  { %993 = vmatprep.subr.bf16.mxu0 %v1725_v27 }
  0x53   :  { %912 = vmatpush1.bf16.msra.mxu1 %v1720_v28 }
  0x54   :  { %994 = vmatpush1.bf16.msra.mxu0 %v1723_v29  ;;  %913 = vmatprep.subr.bf16.mxu1 %v1728_v30 }
  0x55   :  { %995 = vmatprep.subr.bf16.mxu0 %v1731_v31 }
  0x57   :  { %914 = vmatpush1.bf16.msra.mxu1 %v1726_v32 }
  0x58   :  { %996 = vmatpush1.bf16.msra.mxu0 %v1729_v33  ;;  %915 = vmatprep.subr.bf16.mxu1 %v1734_v34 }
  0x59   :  { %997 = vmatprep.subr.bf16.mxu0 %v1737_v35 }
  0x5b   :  { %916 = vmatpush1.bf16.msra.mxu1 %v1732_v36 }
  0x5c   :  { %998 = vmatpush1.bf16.msra.mxu0 %v1735_v37  ;;  %917 = vmatprep.subr.bf16.mxu1 %v1740_v42 }
  0x5d   :  { %999 = vmatprep.subr.bf16.mxu0 %v1743_v44 }
  0x5f   :  { %918 = vmatpush1.bf16.msra.mxu1 %v1738_v46 }
  0x60   :  { %1000 = vmatpush1.bf16.msra.mxu0 %v1741_v47  ;;  %919 = vmatprep.subr.bf16.mxu1 %v1746_v48 }
  0x61   :  { %1001 = vmatprep.subr.bf16.mxu0 %v1749_v49 }
  0x62   :  { %14 = vsyncpa [#allocation3], 0  ;;  %v1750_v54 = vld [vmem:[%s2454_s1 + $0x190] ss:$8 sps:$4 sm:$0xff]   ;;  %v1758_v56 = vld [vmem:[%s2454_s1 + $0x1a4] ss:$8 sps:$4 sm:$0xff]   ;;  %v1418_v17 = vcombine.low %v2191_v38, %v2196_v39  ;;  %v1422_v18 = vcombine.low %v2201_v40, %v2206_v41  ;;  %v172_v32 = vlaneseq }
  0x63   :  { %920 = vmatpush1.bf16.msra.mxu1 %v1744_v50  ;;  %v1753_v55 = vld [vmem:[%s2454_s1 + $0x390] ss:$8 sps:$4 sm:$0xff]   ;;  %v1761_v57 = vld [vmem:[%s2454_s1 + $0x3a4] ss:$8 sps:$4 sm:$0xff]   ;;  %v1756_v58 = vld [vmem:[%s2454_s1 + $0x1a0] ss:$8 sps:$4 sm:$0xff]  }
  0x64   :  { %1002 = vmatpush1.bf16.msra.mxu0 %v1747_v51  ;;  %921 = vmatprep.subr.bf16.mxu1 %v1752_v52  ;;  %v1759_v59 = vld [vmem:[%s2454_s1 + $0x3a0] ss:$8 sps:$4 sm:$0xff]   ;;  %v1764_v60 = vld [vmem:[%s2454_s1 + $0x1b4] ss:$8 sps:$4 sm:$0xff]   ;;  %v1762_v62 = vld [vmem:[%s2454_s1 + $0x1b0] ss:$8 sps:$4 sm:$0xff]  }
  0x65   :  { %1003 = vmatprep.subr.bf16.mxu0 %v1755_v53  ;;  %v1767_v61 = vld [vmem:[%s2454_s1 + $0x3b4] ss:$8 sps:$4 sm:$0xff]   ;;  %v1765_v63 = vld [vmem:[%s2454_s1 + $0x3b0] ss:$8 sps:$4 sm:$0xff]   ;;  %v1770_v0 = vld [vmem:[%s2454_s1 + $0x1c4] ss:$8 sps:$4 sm:$0xff]  }
  0x66   :  { %v1773_v1 = vld [vmem:[%s2454_s1 + $0x3c4] ss:$8 sps:$4 sm:$0xff]   ;;  %v1768_v2 = vld [vmem:[%s2454_s1 + $0x1c0] ss:$8 sps:$4 sm:$0xff]   ;;  %v1776_v4 = vld [vmem:[%s2454_s1 + $0x1d4] ss:$8 sps:$4 sm:$0xff]  }
  0x67   :  { %922 = vmatpush1.bf16.msra.mxu1 %v1750_v54  ;;  %v1771_v3 = vld [vmem:[%s2454_s1 + $0x3c0] ss:$8 sps:$4 sm:$0xff]   ;;  %v1779_v5 = vld [vmem:[%s2454_s1 + $0x3d4] ss:$8 sps:$4 sm:$0xff]   ;;  %v1774_v6 = vld [vmem:[%s2454_s1 + $0x1d0] ss:$8 sps:$4 sm:$0xff]  }
  0x68   :  { %1004 = vmatpush1.bf16.msra.mxu0 %v1753_v55  ;;  %923 = vmatprep.subr.bf16.mxu1 %v1758_v56  ;;  %v1777_v7 = vld [vmem:[%s2454_s1 + $0x3d0] ss:$8 sps:$4 sm:$0xff]   ;;  %v1782_v9 = vld [vmem:[%s2454_s1 + $0x1e4] ss:$8 sps:$4 sm:$0xff]   ;;  %v1780_v11 = vld [vmem:[%s2454_s1 + $0x1e0] ss:$8 sps:$4 sm:$0xff]  }
  0x69   :  { %1005 = vmatprep.subr.bf16.mxu0 %v1761_v57  ;;  %v1785_v10 = vld [vmem:[%s2454_s1 + $0x3e4] ss:$8 sps:$4 sm:$0xff]   ;;  %v1783_v12 = vld [vmem:[%s2454_s1 + $0x3e0] ss:$8 sps:$4 sm:$0xff]   ;;  %v1788_v13 = vld [vmem:[%s2454_s1 + $0x1f4] ss:$8 sps:$4 sm:$0xff]  }
  0x6a   :  { %v1791_v14 = vld [vmem:[%s2454_s1 + $0x3f4] ss:$8 sps:$4 sm:$0xff]   ;;  %v1786_v15 = vld [vmem:[%s2454_s1 + $0x1f0] ss:$8 sps:$4 sm:$0xff]   ;;  %v1792_v19 = vld [vmem:[%s2456_s3] sm:$0xff]   ;;  %v1843_v26 = vmov 0.0  }
  0x6b   :  { %924 = vmatpush1.bf16.msra.mxu1 %v1756_v58  ;;  %v1789_v16 = vld [vmem:[%s2454_s1 + $0x3f0] ss:$8 sps:$4 sm:$0xff]   ;;  %v1793_v20 = vld [vmem:[%s2456_s3 + $0x8] sm:$0xff]   ;;  %v1796_v23 = vld [vmem:[%s2456_s3 + $0x20] sm:$0xff]   ;;  %v173_v33 = vshrl.u32 %v172_v32, 7  ;;  %v1057_v50 = vrot.slane %v1843_v26, 6 }
  0x6c   :  { %1006 = vmatpush1.bf16.msra.mxu0 %v1759_v59  ;;  %925 = vmatprep.subr.bf16.mxu1 %v1764_v60  ;;  %v1794_v21 = vld [vmem:[%s2456_s3 + $0x10] sm:$0xff]   ;;  %v1795_v22 = vld [vmem:[%s2456_s3 + $0x18] sm:$0xff]   ;;  %v1797_v24 = vld [vmem:[%s2456_s3 + $0x28] sm:$0xff]   ;;  %vm1031_vm0 = vcmask 1042944   ;;  %vm1065_vm1 = vcmask 1041408   ;;  %vm1068_vm2 = vcmask 1043456  }
  0x6d   :  { %1007 = vmatprep.subr.bf16.mxu0 %v1767_v61  ;;  %v1798_v25 = vld [vmem:[%s2456_s3 + $0x30] sm:$0xff]   ;;  %v1799_v27 = vld [vmem:[%s2456_s3 + $0x38] sm:$0xff]   ;;  %v1800_v28 = vld [vmem:[%s2456_s3 + $0x40] sm:$0xff]   ;;  %v2373_v34 = vsub.s32 0, %v173_v33  ;;  %v2378_v36 = vsub.s32 1, %v173_v33  ;;  %v1067_v57 = vsel %vm1065_vm1, 0.0, %v1057_v50 }
  0x6e   :  { %v1801_v29 = vld [vmem:[%s2456_s3 + $0x48] sm:$0xff]   ;;  %v1802_v30 = vld [vmem:[%s2456_s3 + $0x50] sm:$0xff]   ;;  %v1803_v31 = vld [vmem:[%s2456_s3 + $0x58] sm:$0xff]   ;;  %vm1051_vm3 = vcmask 523264   ;;  %vm1048_vm4 = vcmask 1040384   ;;  %s1844_s27 = smov 32  }
  0x6f   :  { %926 = vmatpush1.bf16.msra.mxu1 %v1762_v62  ;;  %v170_v35 = vld [vmem:[%s2455_s2] sm:$0x3]  ;;  %vm1238_vm5 = vcmask 261120   ;;  %vm1248_vm6 = vcmask 779264   ;;  %vm1846_vm7 = vmmov 0   ;;  %vm1389_vm8 = vcmask 254976  }
  0x70   :  { %1008 = vmatpush1.bf16.msra.mxu0 %v1765_v63  ;;  %927 = vmatprep.subr.bf16.mxu1 %v1770_v0  ;;  %v175_v37 = vrot.slane %v170_v35, %v2373_v34 }
  0x71   :  { %1009 = vmatprep.subr.bf16.mxu0 %v1773_v1 }
  0x73   :  { %928 = vmatpush1.bf16.msra.mxu1 %v1768_v2 }
  0x74   :  { %1010 = vmatpush1.bf16.msra.mxu0 %v1771_v3  ;;  %929 = vmatprep.subr.bf16.mxu1 %v1776_v4 }
  0x75   :  { %1011 = vmatprep.subr.bf16.mxu0 %v1779_v5 }
  0x77   :  { %930 = vmatpush1.bf16.msra.mxu1 %v1774_v6 }
  0x78   :  { %1012 = vmatpush1.bf16.msra.mxu0 %v1777_v7  ;;  %931 = vmatprep.subr.bf16.mxu1 %v1782_v9 }
  0x79   :  { %1013 = vmatprep.subr.bf16.mxu0 %v1785_v10 }
  0x7b   :  { %932 = vmatpush1.bf16.msra.mxu1 %v1780_v11 }
  0x7c   :  { %1014 = vmatpush1.bf16.msra.mxu0 %v1783_v12  ;;  %933 = vmatprep.subr.bf16.mxu1 %v1788_v13  ;;  %v1061_v13 = vrot.slane %v1843_v26, 4 }
  0x7d   :  { %1015 = vmatprep.subr.bf16.mxu0 %v1791_v14 }
  0x7f   :  { %934 = vmatpush1.bf16.msra.mxu1 %v1786_v15 }
  0x80   :  { %1016 = vmatpush1.bf16.msra.mxu0 %v1789_v16  ;;  %1572 = vmatprep.subr.bf16.mxu1 %v1843_v26 }
  0x81   :  { %1172 = vmatprep.subr.bf16.mxu0 %v1842_v8 }
  0x82   :  { %936 = vmatmul.mubr.bf16.vlgmr.msra.gmra.mrb[0].mxu1 %v1418_v17 }
  0x83   :  { %1018 = vmatmul.mubr.bf16.vlgmr.msra.gmra.mrb[0].mxu0 %v1422_v18  ;;  %1576 = vmatprep.mubr.msk.bf16.mxu1 %vm1846_vm7, %v1843_v26 }
  0x84   :  { %1173 = vmatpush1.bf16.msra.mxu0 %v1792_v19  ;;  %v1212_v19 = vld [vmem:[%s2457_s4] sm:$0x7]  ;;  %s1845_s4 = smov 64  }
  0x85   :  { %1174 = vmatprep.subr.bf16.mxu0 %v1842_v8 }
  0x88   :  { %1175 = vmatpush1.bf16.msra.mxu0 %v1793_v20  ;;  %v1225_v20 = vsub.s32 2, %v173_v33 }
  0x89   :  { %1176 = vmatprep.subr.bf16.mxu0 %v1842_v8 }
  0x8c   :  { %1177 = vmatpush1.bf16.msra.mxu0 %v1794_v21  ;;  %v1216_v21 = vrot.slane %v1212_v19, %v2373_v34 }
  0x8d   :  { %1178 = vmatprep.subr.bf16.mxu0 %v1842_v8 }
  0x90   :  { %1179 = vmatpush1.bf16.msra.mxu0 %v1795_v22  ;;  %v1221_v22 = vrot.slane %v1212_v19, %v2378_v36 }
  0x91   :  { %1180 = vmatprep.subr.bf16.mxu0 %v1842_v8 }
  0x94   :  { %1181 = vmatpush1.bf16.msra.mxu0 %v1796_v23  ;;  %v1226_v23 = vrot.slane %v1212_v19, %v1225_v20 }
  0x95   :  { %1182 = vmatprep.subr.bf16.mxu0 %v1842_v8 }
  0x98   :  { %1183 = vmatpush1.bf16.msra.mxu0 %v1797_v24 }
  0x99   :  { %1184 = vmatprep.subr.bf16.mxu0 %v1842_v8 }
  0x9c   :  { %1185 = vmatpush1.bf16.msra.mxu0 %v1798_v25 }
  0x9d   :  { %1186 = vmatprep.subr.bf16.mxu0 %v1842_v8 }
  0xa0   :  { %1187 = vmatpush1.bf16.msra.mxu0 %v1799_v27 }
  0xa1   :  { %1188 = vmatprep.subr.bf16.mxu0 %v1842_v8 }
  0xa4   :  { %1189 = vmatpush1.bf16.msra.mxu0 %v1800_v28 }
  0xa5   :  { %1190 = vmatprep.subr.bf16.mxu0 %v1842_v8 }
  0xa8   :  { %1191 = vmatpush1.bf16.msra.mxu0 %v1801_v29 }
  0xa9   :  { %1192 = vmatprep.subr.bf16.mxu0 %v1842_v8 }
  0xac   :  { %1193 = vmatpush1.bf16.msra.mxu0 %v1802_v30 }
  0xad   :  { %1194 = vmatprep.subr.bf16.mxu0 %v1842_v8  ;;  %v179_v8 = vrot.slane %v170_v35, %v2378_v36  ;;  %v1241_v35 = vld [vmem:[%s2458_s5] sm:$0x7] }
  0xb0   :  { %1195 = vmatpush1.bf16.msra.mxu0 %v1803_v31 }
 0x155   :  { %v937_v38 = vpop.f32.mrb[0].mxu1 }
 0x156   :  { %v1019_v39 = vpop.f32.mrb[0].mxu0  ;;  %v1580_v40 = vadd.f32 %v937_v38, %v175_v37  ;;  %v939_v41 = vpop.f32.mrb[1].mxu1  ;;  %v1273_v38 = vrot.slane %v1241_v35, %v1225_v20 }
 0x157   :  { %v1021_v42 = vpop.f32.mrb[1].mxu0  ;;  %v940_v43 = vpop.f32.mrb[2].mxu1  ;;  %v1260_v41 = vrot.slane %v1241_v35, %v2378_v36 }
 0x158   :  { %v1022_v44 = vpop.f32.mrb[2].mxu0  ;;  %v1581_v45 = vadd.f32 %v1580_v40, %v1019_v39  ;;  %v941_v46 = vpop.f32.mrb[3].mxu1  ;;  %v1246_v39 = vrot.slane %v1241_v35, %v2373_v34 }
 0x159   :  { %v1023_v47 = vpop.f32.mrb[3].mxu0  ;;  %v1582_v48 = vadd.f32 %v941_v46, %v179_v8 }
 0x15a   :  { %v1026_v49 = vmax.f32 %v1581_v45, 0.0 }
 0x15b   :  { %v1583_v51 = vadd.f32 %v1582_v48, %v1023_v47 }
 0x15c   :  { %v1029_v52 = vrot.slane %v1026_v49, 2  ;;  %v1039_v53 = vrot.slane %v1026_v49, 5  ;;  %v1052_v15 = vsel %vm1051_vm3, %v1026_v49, 0.0  ;;  %v1242_v49 = vld [vmem:[%s2459_s6] sm:$0x7] }
 0x15d   :  { %v1027_v54 = vmax.f32 %v1583_v51, 0.0  ;;  %v1255_v51 = vrot.slane %v1242_v49, %v2373_v34 }
 0x15e   :  { %v1032_v55 = vsel %vm1031_vm0, %v1029_v52, 0.0  ;;  %v1041_v56 = vsel %vm1031_vm0, %v1039_v53, 0.0  ;;  %v1268_v52 = vrot.slane %v1242_v49, %v2378_v36  ;;  %v1281_v53 = vrot.slane %v1242_v49, %v1225_v20 }
 0x15f   :  { %v1033_v58 = vrot.slane %v1032_v55, 4  ;;  %v1042_v59 = vrot.slane %v1041_v56, 4  ;;  %v1062_v60 = vrot.slane %v1027_v54, 4 }
 0x161   :  { %v1034_v61 = vadd.f32 %v1033_v58, %v1032_v55  ;;  %v1043_v62 = vadd.f32 %v1042_v59, %v1041_v56  ;;  %v1070_v63 = vsel %vm1068_vm2, %v1067_v57, %v1062_v60 }
 0x162   :  { %v1072_v0 = vpack.c.bf16 %v1070_v63, %v1070_v63 }
 0x163   :  { %v1035_v1 = vrot.slane %v1034_v61, 2  ;;  %v1044_v2 = vrot.slane %v1043_v62, 2 }
 0x164   :  { %1564 = vmatprep.mubr.msk.bf16.mxu0 %vm1051_vm3, %v1072_v0 }
 0x165   :  { %v1036_v3 = vadd.f32 %v1035_v1, %v1034_v61  ;;  %v1045_v4 = vadd.f32 %v1044_v2, %v1043_v62 }
 0x167   :  { %v1037_v5 = vrot.slane %v1036_v3, 1  ;;  %v1046_v6 = vrot.slane %v1045_v4, 1 }
 0x169   :  { %v1038_v7 = vadd.f32 %v1037_v5, %v1036_v3  ;;  %v1047_v9 = vadd.f32 %v1046_v6, %v1045_v4 }
 0x16b   :  { %v1049_v10 = vsel %vm1048_vm4, %v1038_v7, %v1047_v9 }
 0x16c   :  { %v1050_v11 = vmul.f32 0.33333334, %v1049_v10 }
 0x16e   :  { %v1053_v12 = vsel %vm1051_vm3, 0.0, %v1050_v11  ;;  %v1804_v11 = vld [vmem:[%s2460_s7] sm:$0xff]  }
 0x16f   :  { %v1056_v14 = vrot.slane %v1053_v12, 6  ;;  %1573 = vmatpush3.bf16.msra.mxu1 %v1804_v11  ;;  %v1805_v12 = vld [vmem:[%s2460_s7 + $0x8] sm:$0xff]  }
 0x170   :  { %1574 = vmatprep.subr.bf16.mxu1 %v1843_v26  ;;  %v1565_v26 = vld [vmem:[%s2461_s8] ss:$0 sm:$0xff]  ;;  %s1847_s8 = smov [#allocation2]  }
 0x171   :  { %v1066_v16 = vsel %vm1065_vm1, %v1052_v15, %v1056_v14  ;;  %s1408_s14 = sshll.u32 %s1847_s8, 4  ;;  %s1409_s14 = int_to_ptr.vmem [resolvable:$true] %s1408_s14 }
 0x172   :  { %v1069_v17 = vsel %vm1068_vm2, %v1066_v16, %v1061_v13  ;;  %s1818_s15 = scalar_lea.vmem %s1409_s14, 32  ;;  %p1823_p1 = scmp.lt.s32.totalorder %s1409_s14, %s1409_s14 }
 0x173   :  { %v1071_v18 = vpack.c.bf16 %v1069_v17, %v1069_v17  ;;  %1575 = vmatpush3.bf16.msra.mxu1 %v1805_v12  ;;  %p1819_p0 = scmp.ne.s32.totalorder %s1409_s14, %s1818_s15  ;;  %p1824_p2 = scmp.lt.s32.totalorder %s1818_s15, %s1818_s15 }
 0x175   :  { %1205 = vmatmul.mubr.bf16.vlgmr.msra.gmra.mrb[4].mxu0 %v1071_v18  ;;  %p1825_p3 = por %p1824_p2, %p1823_p1 }
 0x177   :  { %p1826_p4 = pnand %p1825_p3, %p1819_p0 }
 0x248   :  { %v1206_v24 = vpop.f32.mrb[4].mxu0 }
 0x249   :  { %v2396_v25 = vadd.f32 %v1216_v21, %v1206_v24  ;;  %v1208_v27 = vpop.f32.mrb[5].mxu0  ;;  %v2398_v28 = vadd.f32 %v1221_v22, %v1206_v24  ;;  %v2400_v30 = vadd.f32 %v1226_v23, %v1206_v24 }
 0x24a   :  { %v1209_v29 = vpop.f32.mrb[6].mxu0 }
 0x24b   :  { %v1210_v31 = vpop.f32.mrb[7].mxu0  ;;  %v1229_v32 = vrot.slane %v2398_v28, 2  ;;  %v1234_v33 = vrot.slane %v2400_v30, 4 }
 0x24d   :  { %1230 = vrot.lane.b32.xlu0 %v1229_v32, %s1844_s27 }
 0x251   :  { %1235 = vrot.lane.b32.xlu0 %v1234_v33, %s1845_s4 }
 0x2bf   :  { %v1231_v37 = vpop.permute.xlu0 %1230 }
 0x2c0   :  { %v1239_v8 = vsel %vm1238_vm5, %v2396_v25, %v1231_v37 }
 0x2c3   :  { %v1236_v40 = vpop.permute.xlu0 %1235 }
 0x2c4   :  { %v1240_v42 = vsel %vm1051_vm3, %v1239_v8, %v1236_v40 }
 0x2c5   :  { %v1274_v43 = vmul.f32 %v1273_v38, %v1240_v42  ;;  %v1247_v44 = vmul.f32 %v1246_v39, %v1240_v42  ;;  %v1261_v47 = vmul.f32 %v1260_v41, %v1240_v42 }
 0x2c7   :  { %v1275_v45 = vsel %vm1248_vm6, %v1274_v43, 0.0  ;;  %v1249_v46 = vsel %vm1248_vm6, %v1247_v44, 0.0  ;;  %v1262_v48 = vsel %vm1248_vm6, %v1261_v47, 0.0 }
 0x2c8   :  { %1276 = vadd.xlane.f32.xlu0 %v1275_v45  ;;  %1250 = vadd.xlane.f32.xlu1 %v1249_v46 }
 0x2cc   :  { %1263 = vadd.xlane.f32.xlu1 %v1262_v48 }
 0x355   :  { %v1251_v50 = vpop.xlane.xlu1 %1250  ;;  %v1277_v54 = vpop.xlane.xlu0 %1276 }
 0x356   :  { %v1256_v56 = vadd.f32 %v1255_v51, %v1251_v50  ;;  %v1282_v58 = vadd.f32 %v1281_v53, %v1277_v54 }
 0x359   :  { %v1264_v55 = vpop.xlane.xlu1 %1263 }
 0x35a   :  { %v1269_v57 = vadd.f32 %v1268_v52, %v1264_v55 }
 0x35c   :  { %v1283_v59 = vmax.f32 %v1256_v56, %v1269_v57 }
 0x35e   :  { %v1284_v60 = vmax.f32 %v1283_v59, %v1282_v58 }
 0x360   :  { %v1285_v61 = vsub.f32 %v1256_v56, %v1284_v60  ;;  %v1288_v62 = vsub.f32 %v1269_v57, %v1284_v60  ;;  %v1291_v63 = vsub.f32 %v1282_v58, %v1284_v60 }
 0x362   :  { %v1286_v0 = vmul.f32 1.442695, %v1285_v61  ;;  %v1289_v1 = vmul.f32 1.442695, %v1288_v62  ;;  %v1292_v2 = vmul.f32 1.442695, %v1291_v63 }
 0x364   :  { %1806 = vpow2.f32 %v1286_v0 }
 0x365   :  { %1808 = vpow2.f32 %v1289_v1 }
 0x366   :  { %1810 = vpow2.f32 %v1292_v2 }
 0x36e   :  { %v1807_v34 = vpop.eup %1806 }
 0x36f   :  { %v1809_v3 = vpop.eup %1808 }
 0x370   :  { %v1294_v36 = vadd.f32 %v1809_v3, %v1807_v34  ;;  %v1811_v4 = vpop.eup %1810 }
 0x372   :  { %v1295_v5 = vadd.f32 %v1811_v4, %v1294_v36 }
 0x374   :  { %1812 = vrcp.f32 %v1295_v5 }
 0x37e   :  { %v1813_v6 = vpop.eup %1812 }
 0x37f   :  { %v1297_v7 = vmul.f32 %v1813_v6, %v1807_v34  ;;  %v1298_v9 = vmul.f32 %v1813_v6, %v1809_v3  ;;  %v1299_v10 = vmul.f32 %v1813_v6, %v1811_v4 }
 0x381   :  { %1302 = vperm.xlu1 %1598, %v1297_v7  }
 0x385   :  { %1308 = vperm.xlu1 %1598, %v1298_v9  }
 0x389   :  { %1316 = vperm.xlu1 %1598, %v1299_v10  }
 0x400   :  { %v1303_v13 = vpop.permute.xlu1 %1302 }
 0x401   :  { %v1305_v16 = vmul.f32 %v1303_v13, %v2396_v25 }
 0x404   :  { %v1309_v14 = vpop.permute.xlu1 %1308 }
 0x405   :  { %v1312_v15 = vmul.f32 %v1309_v14, %v1229_v32 }
 0x407   :  { %v1313_v18 = vadd.f32 %v1312_v15, %v1305_v16 }
 0x408   :  { %v1317_v17 = vpop.permute.xlu1 %1316 }
 0x409   :  { %v1320_v19 = vmul.f32 %v1317_v17, %v1234_v33 }
 0x40b   :  { %v1321_v20 = vadd.f32 %v1320_v19, %v1313_v18 }
 0x40d   :  { %v1322_v21 = vpack.c.bf16 %v1321_v20, %v1321_v20 }
 0x40f   :  { %1577 = vmatmul.mubr.msk.bf16.vlgmr.msra.gmra.mrb[4].mxu1 %vm1238_vm5, %v1322_v21 }
 0x4e2   :  { %v1383_v22 = vpop.f32.mrb[4].mxu1 }
 0x4e3   :  { %v1384_v23 = vadd.f32 %v1565_v26, %v1383_v22  ;;  %v1578_v24 = vpop.f32.mrb[5].mxu1 }
 0x4e4   :  { %v1386_v27 = vpop.f32.mrb[6].mxu1 }
 0x4e5   :  { %v1579_v28 = vpop.f32.mrb[7].mxu1  ;;  %v1390_v25 = vsel %vm1389_vm8, %v1384_v23, -inf }
 0x4e6   :  { %1391 = vmax.xlane.f32.xlu1 %v1390_v25 }
 0x573   :  { %v1392_v29 = vpop.xlane.xlu1 %1391 }
 0x574   :  { %v1393_v30 = vsub.f32 %v1384_v23, %v1392_v29 }
 0x576   :  { %v1394_v31 = vmul.f32 1.442695, %v1393_v30 }
 0x578   :  { %1814 = vpow2.f32 %v1394_v31 }
 0x582   :  { %v1815_v32 = vpop.eup %1814 }
 0x583   :  { %v1396_v33 = vsel %vm1389_vm8, %v1815_v32, 0.0 }
 0x584   :  { %1397 = vadd.xlane.f32.xlu0 %v1396_v33 }
 0x611   :  { %v1398_v35 = vpop.xlane.xlu0 %1397 }
 0x612   :  { %1816 = vrcp.f32 %v1398_v35 }
 0x61c   :  { %v1817_v37 = vpop.eup %1816 }
 0x61d   :  { %v1400_v38 = vmul.f32 %v1817_v37, %v1815_v32 }
 0x61f   :  { %1401 = vst.msk [vmem:[#allocation2] sm:$0x3] %vm1389_vm8, %v1400_v38 }
 0x620   :  { %1829 = shalt.err (!%p1826_p4)
}
 0x621   :  { %s1830_s18 = scalar_lea.hbm %s2462_s9, 32 }
 0x622   :  { %p1831_p5 = scmp.ne.s32.totalorder %s2462_s9, %s1830_s18  ;;  %p1834_p6 = scmp.lt.u32.totalorder %s1830_s18, %s2462_s9 }
 0x624   :  { %p1836_p7 = pnand %p1834_p6, %p1831_p5 }
 0x626   :  { %1839 = shalt.err (!%p1836_p7)
}
 0x627   :  { %1411 = dma.vmem_to_hbm [thread:$0]  %s1409_s14, 32, %s2462_s9, [#allocation3]  }
 0x628   :  { %1840 = dma.done.wait [#allocation3], 32  }
 0x629   :  { %1841 = vsyncadd [#allocation3], 4294967264 }
 0x62a   :  { %1415 = vsyncpa [#allocation3], 1 }

</bundles_post_ra>
